<compile_context>
chip_gen: v7x
topology: tpu7x:2x2x1
jax: 0.10.0
libtpu: 0.0.40
codegen_flags: <defaults>
</compile_context>

<pallas_src>
import functools

import jax
import jax.numpy as jnp
from jax import lax
from jax.experimental import pallas as pl
from jax.experimental.pallas import tpu as pltpu


# ----------------------------- Fused Pallas kernel -----------------------------

def _fused_deeponet_kernel(b0_ref, x_func_ref, x_loc_ref, *refs,
                           n_branch, n_trunk):
    """Fused DeepONet forward.

    refs layout (after b0 / x_func / x_loc):
        branch: w_0, b_0, w_1, b_1, ... (n_branch layers)
        trunk : w_0, b_0, w_1, b_1, ... (n_trunk layers)
        out_ref (last)
    Weights are (in, out), biases are (1, out). b0 is a (1,) scalar in SMEM.
    """
    out_ref = refs[-1]
    wb = refs[:-1]
    branch_wb = wb[:2 * n_branch]
    trunk_wb = wb[2 * n_branch:2 * n_branch + 2 * n_trunk]

    # Branch MLP: Linear -> ReLU after every layer (including the last).
    h = x_func_ref[...]
    for i in range(n_branch):
        w = branch_wb[2 * i][...]
        b = branch_wb[2 * i + 1][...]
        h = jnp.dot(h, w, preferred_element_type=jnp.float32) + b
        h = jnp.maximum(h, 0.0)

    # Trunk MLP: Linear -> Tanh after every layer (including the last).
    t = x_loc_ref[...]
    for i in range(n_trunk):
        w = trunk_wb[2 * i][...]
        b = trunk_wb[2 * i + 1][...]
        t = jnp.dot(t, w, preferred_element_type=jnp.float32) + b
        t = jnp.tanh(t)

    # Merge: einsum('bp,np->bn') — contract over the shared p axis directly,
    # no materialized transpose of the trunk features.
    y = lax.dot_general(
        h, t,
        dimension_numbers=(((1,), (1,)), ((), ())),
        preferred_element_type=jnp.float32,
    )
    out_ref[...] = (y + b0_ref[0]).astype(out_ref.dtype)


def deeponet_forward(params_branch, params_trunk, b0, x_func, x_loc):
    """Single fused pallas_call for the whole DeepONet forward pass."""
    B = x_func.shape[0]
    N = x_loc.shape[0]
    p_branch = params_branch[-1][0].shape[1]
    p_trunk = params_trunk[-1][0].shape[1]
    if p_branch != p_trunk:
        raise AssertionError("Output sizes of branch net and trunk net do not match.")

    flat_wb = []
    for w, b in params_branch:
        flat_wb += [w, b]
    for w, b in params_trunk:
        flat_wb += [w, b]

    kern = functools.partial(
        _fused_deeponet_kernel,
        n_branch=len(params_branch),
        n_trunk=len(params_trunk),
    )

    in_specs = (
        [pl.BlockSpec(memory_space=pltpu.SMEM)]                  # b0 scalar
        + [pl.BlockSpec(memory_space=pltpu.VMEM)] * (2 + len(flat_wb))
    )

    return pl.pallas_call(
        kern,
        out_shape=jax.ShapeDtypeStruct((B, N), jnp.float32),
        in_specs=in_specs,
        out_specs=pl.BlockSpec(memory_space=pltpu.VMEM),
    )(jnp.asarray(b0, jnp.float32).reshape(1), x_func, x_loc, *flat_wb)


# ----------------------------- Params / reference -----------------------------

def init_mlp_params(key, layer_sizes):
    """PyTorch-nn.Linear-style init: U(-1/sqrt(fan_in), +1/sqrt(fan_in)).

    Weights stored as (in, out) so y = x @ W + b; biases stored as (1, out)
    so the kernel can add them without any per-call reshape.
    """
    params = []
    for i in range(len(layer_sizes) - 1):
        fan_in, fan_out = layer_sizes[i], layer_sizes[i + 1]
        key, kw, kb = jax.random.split(key, 3)
        bound = 1.0 / jnp.sqrt(jnp.float32(fan_in))
        w = jax.random.uniform(kw, (fan_in, fan_out), jnp.float32, -bound, bound)
        b = jax.random.uniform(kb, (1, fan_out), jnp.float32, -bound, bound)
        params.append((w, b))
    return params, key


def deeponet_reference(params_branch, params_trunk, b0, x_func, x_loc):
    h = x_func
    for (w, b) in params_branch:
        h = jnp.maximum(h @ w + b, 0.0)
    t = x_loc
    for (w, b) in params_trunk:
        t = jnp.tanh(t @ w + b)
    return jnp.einsum("bi,ni->bn", h, t) + b0


# ----------------------------------- Main -----------------------------------

if __name__ == "__main__":
    key = jax.random.PRNGKey(0)

    # Lane-dense DeepONet configuration: hidden width and latent dim p = 128,
    # N (query points) = 128 so the (B, N) output store is unmasked.
    layer_sizes_branch = [16, 128, 128]   # d_branch=16 sensors -> p=128
    layer_sizes_trunk = [2, 128, 128]     # d_trunk=2 (x,y)     -> p=128

    params_branch, key = init_mlp_params(key, layer_sizes_branch)
    params_trunk, key = init_mlp_params(key, layer_sizes_trunk)
    b0 = jnp.float32(0.0)  # nn.Parameter(torch.tensor(0.0))

    B = 8     # number of input functions (sublane-aligned)
    N = 128   # number of query locations (lane-aligned)
    key, k1, k2 = jax.random.split(key, 3)
    x_func = jax.random.normal(k1, (B, layer_sizes_branch[0]), jnp.float32)
    x_loc = jax.random.normal(k2, (N, layer_sizes_trunk[0]), jnp.float32)

    y = deeponet_forward(params_branch, params_trunk, b0, x_func, x_loc)
    y = jax.block_until_ready(y)

    y_ref = deeponet_reference(params_branch, params_trunk, b0, x_func, x_loc)
    assert y.shape == (B, N)
    assert jnp.allclose(y, y_ref, atol=1e-3, rtol=1e-4), float(
        jnp.max(jnp.abs(y - y_ref)))

    print("KERNEL_OK")
</pallas_src>

<mosaic_0001>
module attributes {stable_mosaic.version = 11 : i64} {
  func.func @_fused_deeponet_kernel(%arg0: memref<1xf32, #tpu.memory_space<smem>>, %arg1: memref<8x16xf32, #tpu.memory_space<vmem>>, %arg2: memref<128x2xf32, #tpu.memory_space<vmem>>, %arg3: memref<16x128xf32, #tpu.memory_space<vmem>>, %arg4: memref<1x128xf32, #tpu.memory_space<vmem>>, %arg5: memref<128x128xf32, #tpu.memory_space<vmem>>, %arg6: memref<1x128xf32, #tpu.memory_space<vmem>>, %arg7: memref<2x128xf32, #tpu.memory_space<vmem>>, %arg8: memref<1x128xf32, #tpu.memory_space<vmem>>, %arg9: memref<128x128xf32, #tpu.memory_space<vmem>>, %arg10: memref<1x128xf32, #tpu.memory_space<vmem>>, %arg11: memref<8x128xf32, #tpu.memory_space<vmem>>) attributes {dimension_semantics = [], scalar_prefetch = 0 : i64, scratch_operands = 0 : i64, tpu.core_type = #tpu.core_type<tc>} {
    %c0 = arith.constant 0 : index
    %c0_0 = arith.constant 0 : index
    %0 = vector.load %arg1[%c0, %c0_0] : memref<8x16xf32, #tpu.memory_space<vmem>>, vector<8x16xf32>
    %c0_1 = arith.constant 0 : index
    %c0_2 = arith.constant 0 : index
    %1 = vector.load %arg3[%c0_1, %c0_2] : memref<16x128xf32, #tpu.memory_space<vmem>>, vector<16x128xf32>
    %c0_3 = arith.constant 0 : index
    %c0_4 = arith.constant 0 : index
    %2 = vector.load %arg4[%c0_3, %c0_4] : memref<1x128xf32, #tpu.memory_space<vmem>>, vector<1x128xf32>
    %cst = arith.constant dense<0.000000e+00> : vector<8x128xf32>
    %3 = tpu.matmul %0, %1, %cst {dimension_numbers = #tpu.dot_dimension_numbers<[1], [0], [0], [1], [0, 0, 1, 1], [], []>} : vector<8x16xf32>, vector<16x128xf32>, vector<8x128xf32> -> vector<8x128xf32>
    %4 = vector.broadcast %2 : vector<1x128xf32> to vector<8x128xf32>
    %5 = arith.addf %3, %4 : vector<8x128xf32>
    %cst_5 = arith.constant 0.000000e+00 : f32
    %6 = vector.broadcast %cst_5 : f32 to vector<8x128xf32>
    %7 = arith.maximumf %5, %6 : vector<8x128xf32>
    %c0_6 = arith.constant 0 : index
    %c0_7 = arith.constant 0 : index
    %8 = vector.load %arg5[%c0_6, %c0_7] : memref<128x128xf32, #tpu.memory_space<vmem>>, vector<128x128xf32>
    %c0_8 = arith.constant 0 : index
    %c0_9 = arith.constant 0 : index
    %9 = vector.load %arg6[%c0_8, %c0_9] : memref<1x128xf32, #tpu.memory_space<vmem>>, vector<1x128xf32>
    %cst_10 = arith.constant dense<0.000000e+00> : vector<8x128xf32>
    %10 = tpu.matmul %7, %8, %cst_10 {dimension_numbers = #tpu.dot_dimension_numbers<[1], [0], [0], [1], [0, 0, 1, 1], [], []>} : vector<8x128xf32>, vector<128x128xf32>, vector<8x128xf32> -> vector<8x128xf32>
    %11 = vector.broadcast %9 : vector<1x128xf32> to vector<8x128xf32>
    %12 = arith.addf %10, %11 : vector<8x128xf32>
    %cst_11 = arith.constant 0.000000e+00 : f32
    %13 = vector.broadcast %cst_11 : f32 to vector<8x128xf32>
    %14 = arith.maximumf %12, %13 : vector<8x128xf32>
    %c0_12 = arith.constant 0 : index
    %c0_13 = arith.constant 0 : index
    %15 = vector.load %arg2[%c0_12, %c0_13] : memref<128x2xf32, #tpu.memory_space<vmem>>, vector<128x2xf32>
    %c0_14 = arith.constant 0 : index
    %c0_15 = arith.constant 0 : index
    %16 = vector.load %arg7[%c0_14, %c0_15] : memref<2x128xf32, #tpu.memory_space<vmem>>, vector<2x128xf32>
    %c0_16 = arith.constant 0 : index
    %c0_17 = arith.constant 0 : index
    %17 = vector.load %arg8[%c0_16, %c0_17] : memref<1x128xf32, #tpu.memory_space<vmem>>, vector<1x128xf32>
    %cst_18 = arith.constant dense<0.000000e+00> : vector<128x128xf32>
    %18 = tpu.matmul %15, %16, %cst_18 {dimension_numbers = #tpu.dot_dimension_numbers<[1], [0], [0], [1], [0, 0, 1, 1], [], []>} : vector<128x2xf32>, vector<2x128xf32>, vector<128x128xf32> -> vector<128x128xf32>
    %19 = vector.broadcast %17 : vector<1x128xf32> to vector<128x128xf32>
    %20 = arith.addf %18, %19 : vector<128x128xf32>
    %21 = math.tanh %20 : vector<128x128xf32>
    %c0_19 = arith.constant 0 : index
    %c0_20 = arith.constant 0 : index
    %22 = vector.load %arg9[%c0_19, %c0_20] : memref<128x128xf32, #tpu.memory_space<vmem>>, vector<128x128xf32>
    %c0_21 = arith.constant 0 : index
    %c0_22 = arith.constant 0 : index
    %23 = vector.load %arg10[%c0_21, %c0_22] : memref<1x128xf32, #tpu.memory_space<vmem>>, vector<1x128xf32>
    %cst_23 = arith.constant dense<0.000000e+00> : vector<128x128xf32>
    %24 = tpu.matmul %21, %22, %cst_23 {dimension_numbers = #tpu.dot_dimension_numbers<[1], [0], [0], [1], [0, 0, 1, 1], [], []>} : vector<128x128xf32>, vector<128x128xf32>, vector<128x128xf32> -> vector<128x128xf32>
    %25 = vector.broadcast %23 : vector<1x128xf32> to vector<128x128xf32>
    %26 = arith.addf %24, %25 : vector<128x128xf32>
    %27 = math.tanh %26 : vector<128x128xf32>
    %cst_24 = arith.constant dense<0.000000e+00> : vector<8x128xf32>
    %28 = tpu.matmul %14, %27, %cst_24 {dimension_numbers = #tpu.dot_dimension_numbers<[1], [1], [0], [0], [0, 0, 1, 0], [], []>} : vector<8x128xf32>, vector<128x128xf32>, vector<8x128xf32> -> vector<8x128xf32>
    %c0_25 = arith.constant 0 : index
    %29 = memref.load %arg0[%c0_25] : memref<1xf32, #tpu.memory_space<smem>>
    %30 = vector.broadcast %29 : f32 to vector<8x128xf32>
    %31 = arith.addf %28, %30 : vector<8x128xf32>
    %c0_26 = arith.constant 0 : index
    %c0_27 = arith.constant 0 : index
    %32 = vector.load %arg11[%c0_26, %c0_27] : memref<8x128xf32, #tpu.memory_space<vmem>>, vector<8x128xf32>
    tpu.vector_store %arg11[%c0_26, %c0_27], %31 {strides = array<i32>} : memref<8x128xf32, #tpu.memory_space<vmem>>, vector<8x128xf32>,
    return
  }
}

</mosaic_0001>

<bundles_post_ra>
// kernel: tpu_custom_call.1
= control target key start
LH: loop header
LB: loop body
LE: loop exit
PB: predicated region body
PF: predicated region fallthrough
CT: control target
= control target key end

     0   :  { %17 = vsyncpa [#allocation4], 0  ;;  %s1559_s0 = inlined_call_operand.<no memory space> [shape: f32[1], index: 0, kind: input, shape index: {}]   ;;  %s1560_s1 = inlined_call_operand.hbm [shape: f32[8,16], index: 1, kind: input, shape index: {}]   ;;  %s1561_s2 = inlined_call_operand.vmem [shape: f32[128,2], index: 2, kind: input, shape index: {}]   ;;  %s1562_s3 = inlined_call_operand.vmem [shape: f32[16,128], index: 3, kind: input, shape index: {}]   ;;  %s1563_s4 = inlined_call_operand.vmem [shape: f32[1,128], index: 4, kind: input, shape index: {}]   ;;  %s1564_s5 = inlined_call_operand.vmem [shape: f32[128,128], index: 5, kind: input, shape index: {}]   ;;  %s1565_s6 = inlined_call_operand.vmem [shape: f32[1,128], index: 6, kind: input, shape index: {}]   ;;  %s1566_s7 = inlined_call_operand.vmem [shape: f32[2,128], index: 7, kind: input, shape index: {}]   ;;  %s1567_s8 = inlined_call_operand.vmem [shape: f32[1,128], index: 8, kind: input, shape index: {}]   ;;  %s1568_s9 = inlined_call_operand.hbm [shape: f32[128,128], index: 9, kind: input, shape index: {}]   ;;  %s1569_s10 = inlined_call_operand.vmem [shape: f32[1,128], index: 10, kind: input, shape index: {}]   ;;  %s1570_s11 = inlined_call_operand.hbm [shape: f32[8,128], index: 11, kind: output, shape index: {}]  }
   0x1   :  { %18 = vsyncpa [#allocation7], 0 }
   0x2   :  { %19 = vsyncpa [#allocation5], 0  ;;  %s1250_s17 = smov [#allocation3]   ;;  %s1251_s19 = smov [#allocation6]  }
   0x3   :  { %s28_s18 = sshll.u32 %s1250_s17, 4  ;;  %s51_s20 = sshll.u32 %s1251_s19, 4  ;;  %s29_s18 = int_to_ptr.vmem [resolvable:$true] %s28_s18  ;;  %s1318_s20 = int_to_ptr.vmem [resolvable:$true] %s51_s20 }
   0x4   :  { %s1178_s23 = scalar_lea.hbm %s1560_s1, 128 }
   0x5   :  { %p1179_p0 = scmp.ne.s32.totalorder %s1560_s1, %s1178_s23  ;;  %p1182_p1 = scmp.lt.u32.totalorder %s1178_s23, %s1560_s1 }
   0x7   :  { %p1184_p2 = pnand %p1182_p1, %p1179_p0 }
   0x9   :  { %1187 = shalt.err (!%p1184_p2)
}
   0xa   :  { %s1188_s28 = scalar_lea.vmem %s29_s18, 128  ;;  %p1193_p4 = scmp.lt.s32.totalorder %s29_s18, %s29_s18 }
   0xb   :  { %p1189_p3 = scmp.ne.s32.totalorder %s29_s18, %s1188_s28  ;;  %p1194_p5 = scmp.lt.s32.totalorder %s1188_s28, %s1188_s28 }
   0xd   :  { %p1195_p6 = por %p1194_p5, %p1193_p4 }
   0xf   :  { %p1196_p7 = pnand %p1195_p6, %p1189_p3 }
  0x11   :  { %1199 = shalt.err (!%p1196_p7)
}
  0x12   :  { %31 = dma.hbm_to_vmem [thread:$0]  %s1560_s1, 128, %s29_s18, [#allocation4]  }
  0x13   :  { %s1200_s14 = scalar_lea.hbm %s1568_s9, 2048 }
  0x14   :  { %p1201_p8 = scmp.ne.s32.totalorder %s1568_s9, %s1200_s14  ;;  %p1204_p9 = scmp.lt.u32.totalorder %s1200_s14, %s1568_s9 }
  0x16   :  { %p1206_p10 = pnand %p1204_p9, %p1201_p8 }
  0x18   :  { %1209 = shalt.err (!%p1206_p10)
}
  0x19   :  { %s1210_s21 = scalar_lea.vmem %s1318_s20, 2048  ;;  %p1215_p12 = scmp.lt.s32.totalorder %s1318_s20, %s1318_s20 }
  0x1a   :  { %p1211_p11 = scmp.ne.s32.totalorder %s1318_s20, %s1210_s21  ;;  %p1216_p13 = scmp.lt.s32.totalorder %s1210_s21, %s1210_s21 }
  0x1c   :  { %p1217_p0 = por %p1216_p13, %p1215_p12 }
  0x1e   :  { %p1218_p1 = pnand %p1217_p0, %p1211_p11 }
  0x20   :  { %1221 = shalt.err (!%p1218_p1)
}
  0x21   :  { %s1252_s1 = smov 128   ;;  %s1253_s18 = smov 8  }
  0x22   :  { %57 = dma.hbm_to_vmem [thread:$0]  %s1568_s9, 2048, %s1318_s20, [#allocation7], %s1252_s1, %s1252_s1, %s1253_s18  }
  0x23   :  { %1244 = dma.done.wait [#allocation4], 128  }
  0x24   :  { %1245 = vsyncadd [#allocation4], 4294967168 }
  0x25   :  { %1246 = dma.done.wait [#allocation7], 2048  }
  0x26   :  { %1247 = vsyncadd [#allocation7], 4294965248  ;;  %v1254_v0 = vmov 0.0|0.0   ;;  %vm1255_vm0 = vmmov 0   ;;  %v1256_v1 = vmov 0.0   ;;  %v67_v2 = vld [vmem:[%s1562_s3] sm:$0xff] }
  0x27   :  { %1023 = vmatprep.subr.bf16.mxu0 %v1254_v0  ;;  %868 = vmatprep.mubr.msk.f32.mxu0 %vm1255_vm0, %v1256_v1  ;;  %v68_v3 = vld [vmem:[%s1562_s3 + $0x8] sm:$0xff]  ;;  %v261_v5 = vld [vmem:[%s1566_s7] sm:$0x3]  ;;  %vm318_vm1 = vcmask 1041408   ;;  %vm76_vm2 = vcmask 130048   ;;  %vm269_vm3 = vcmask 15360  }
  0x28   :  { %1026 = vmatprep.subr.bf16.mxu1 %v1254_v0  ;;  %903 = vmatprep.mubr.msk.f32.mxu1 %vm1255_vm0, %v1256_v1  ;;  %v1024_v4 = vpack.c.bf16 %v68_v3, %v67_v2  ;;  %v66_v6 = vld [vmem:[#allocation3] sm:$0xff]  ;;  %v246_v8 = vld [vmem:[%s1561_s2 + $0x8] sm:$0xff]  ;;  %v153_v11 = vld [vmem:[%s1564_s5 + $0x10] sm:$0xff]  ;;  %s1257_s28 = smov [#allocation8]  }
  0x29   :  { %v245_v7 = vld [vmem:[%s1561_s2] sm:$0xff]  ;;  %v152_v10 = vld [vmem:[%s1564_s5 + $0x8] sm:$0xff]  ;;  %v154_v12 = vld [vmem:[%s1564_s5 + $0x18] sm:$0xff]  ;;  %s746_s29 = sshll.u32 %s1257_s28, 4  ;;  %s747_s29 = int_to_ptr.vmem [resolvable:$true] %s746_s29 }
  0x2a   :  { %1025 = vmatpush3.bf16.msra.mxu0 %v1024_v4  ;;  %v151_v9 = vld [vmem:[%s1564_s5] sm:$0xff]  ;;  %v247_v13 = vld [vmem:[%s1561_s2 + $0x10] sm:$0xff]  ;;  %v483_v15 = vld [vmem:[#allocation6] sm:$0xff]  ;;  %v1030_v18 = vpack.c.bf16 %v154_v12, %v153_v11  ;;  %s1222_s30 = scalar_lea.vmem %s747_s29, 128  ;;  %p1227_p3 = scmp.lt.s32.totalorder %s747_s29, %s747_s29 }
  0x2b   :  { %906 = vmatprep.subr.msk.mxu0 %vm318_vm1, %v261_v5  ;;  %v1027_v14 = vpack.c.bf16 %v152_v10, %v151_v9  ;;  %v484_v16 = vld [vmem:[#allocation6 + $0x8] sm:$0xff]  ;;  %v248_v17 = vld [vmem:[%s1561_s2 + $0x18] sm:$0xff]  ;;  %v155_v21 = vld [vmem:[%s1564_s5 + $0x20] sm:$0xff]  ;;  %p1223_p2 = scmp.ne.s32.totalorder %s747_s29, %s1222_s30  ;;  %p1228_p4 = scmp.lt.s32.totalorder %s1222_s30, %s1222_s30 }
  0x2c   :  { %v1050_v19 = vpack.c.bf16 %v484_v16, %v483_v15  ;;  %v485_v20 = vld [vmem:[#allocation6 + $0x10] sm:$0xff]  ;;  %v156_v22 = vld [vmem:[%s1564_s5 + $0x28] sm:$0xff]  ;;  %v486_v23 = vld [vmem:[#allocation6 + $0x18] sm:$0xff] }
  0x2d   :  { %869 = vmatmul.mubr.msk.f32.vlgmr.msra.gmra.mrb[0].mxu0 %vm76_vm2, %v66_v6  ;;  %1028 = vmatpush3.bf16.msra.mxu1 %v1027_v14  ;;  %v249_v24 = vld [vmem:[%s1561_s2 + $0x20] sm:$0xff]  ;;  %v1054_v25 = vpack.c.bf16 %v486_v23, %v485_v20  ;;  %v487_v26 = vld [vmem:[#allocation6 + $0x20] sm:$0xff]  ;;  %v488_v27 = vld [vmem:[#allocation6 + $0x28] sm:$0xff]  ;;  %v1033_v28 = vpack.c.bf16 %v156_v22, %v155_v21  ;;  %p1229_p5 = por %p1228_p4, %p1227_p3 }
  0x2e   :  { %907 = vmatpush3.msk.msra.mxu0 %vm318_vm1, %v261_v5  ;;  %908 = vmatprep.mubr.msk.f32.mxu0 %vm269_vm3, %v245_v7  ;;  %v250_v29 = vld [vmem:[%s1561_s2 + $0x28] sm:$0xff]  ;;  %v157_v30 = vld [vmem:[%s1564_s5 + $0x30] sm:$0xff]  ;;  %v158_v31 = vld [vmem:[%s1564_s5 + $0x38] sm:$0xff]  ;;  %v1058_v33 = vpack.c.bf16 %v488_v27, %v487_v26 }
  0x2f   :  { %1029 = vmatprep.subr.bf16.mxu1 %v1254_v0  ;;  %1051 = vmatprep.subr.bf16.mxu0 %v1050_v19  ;;  %v251_v32 = vld [vmem:[%s1561_s2 + $0x30] sm:$0xff]  ;;  %v1036_v34 = vpack.c.bf16 %v158_v31, %v157_v30  ;;  %v252_v35 = vld [vmem:[%s1561_s2 + $0x38] sm:$0xff]  ;;  %v159_v36 = vld [vmem:[%s1564_s5 + $0x40] sm:$0xff]  ;;  %p1230_p6 = pnand %p1229_p5, %p1223_p2 }
  0x30   :  { %v160_v37 = vld [vmem:[%s1564_s5 + $0x48] sm:$0xff]  ;;  %v253_v38 = vld [vmem:[%s1561_s2 + $0x40] sm:$0xff]  ;;  %v161_v41 = vld [vmem:[%s1564_s5 + $0x50] sm:$0xff] }
  0x31   :  { %909 = vmatmul.mubr.msk.f32.vlgmr.msra.gmra.mrb[2].mxu0 %vm269_vm3, %v246_v8  ;;  %1031 = vmatpush3.bf16.msra.mxu1 %v1030_v18  ;;  %v1039_v39 = vpack.c.bf16 %v160_v37, %v159_v36  ;;  %v254_v40 = vld [vmem:[%s1561_s2 + $0x48] sm:$0xff]  ;;  %v162_v42 = vld [vmem:[%s1564_s5 + $0x58] sm:$0xff]  ;;  %v255_v43 = vld [vmem:[%s1561_s2 + $0x50] sm:$0xff] }
  0x32   :  { %911 = vmatprep.mubr.msk.f32.mxu0 %vm269_vm3, %v247_v13  ;;  %1053 = vmatpush3.bf16.msra.mxu0 %v1050_v19  ;;  %v1042_v44 = vpack.c.bf16 %v162_v42, %v161_v41  ;;  %v256_v45 = vld [vmem:[%s1561_s2 + $0x58] sm:$0xff]  ;;  %v163_v46 = vld [vmem:[%s1564_s5 + $0x60] sm:$0xff]  ;;  %v164_v47 = vld [vmem:[%s1564_s5 + $0x68] sm:$0xff] }
  0x33   :  { %1032 = vmatprep.subr.bf16.mxu1 %v1254_v0  ;;  %1055 = vmatprep.subr.bf16.mxu0 %v1054_v25  ;;  %v257_v48 = vld [vmem:[%s1561_s2 + $0x60] sm:$0xff]  ;;  %v1045_v49 = vpack.c.bf16 %v164_v47, %v163_v46  ;;  %v258_v50 = vld [vmem:[%s1561_s2 + $0x68] sm:$0xff]  ;;  %v259_v51 = vld [vmem:[%s1561_s2 + $0x70] sm:$0xff] }
  0x34   :  { %v260_v52 = vld [vmem:[%s1561_s2 + $0x78] sm:$0xff]  ;;  %v490_v54 = vld [vmem:[#allocation6 + $0x38] sm:$0xff]  ;;  %v165_v56 = vld [vmem:[%s1564_s5 + $0x70] sm:$0xff] }
  0x35   :  { %912 = vmatmul.mubr.msk.f32.gmra.mrb[4].mxu0 %vm269_vm3, %v248_v17  ;;  %1034 = vmatpush3.bf16.msra.mxu1 %v1033_v28  ;;  %v489_v53 = vld [vmem:[#allocation6 + $0x30] sm:$0xff]  ;;  %v491_v59 = vld [vmem:[#allocation6 + $0x40] sm:$0xff]  ;;  %v492_v60 = vld [vmem:[#allocation6 + $0x48] sm:$0xff] }
  0x36   :  { %914 = vmatprep.mubr.msk.f32.mxu0 %vm269_vm3, %v249_v24  ;;  %1057 = vmatpush3.bf16.msra.mxu0 %v1054_v25  ;;  %v1062_v55 = vpack.c.bf16 %v490_v54, %v489_v53  ;;  %v166_v57 = vld [vmem:[%s1564_s5 + $0x78] sm:$0xff]  ;;  %v1066_v61 = vpack.c.bf16 %v492_v60, %v491_v59  ;;  %v494_v63 = vld [vmem:[#allocation6 + $0x58] sm:$0xff]  ;;  %v495_v3 = vld [vmem:[#allocation6 + $0x60] sm:$0xff] }
  0x37   :  { %1035 = vmatprep.subr.bf16.mxu1 %v1254_v0  ;;  %1059 = vmatprep.subr.bf16.mxu0 %v1058_v33  ;;  %v1048_v58 = vpack.c.bf16 %v166_v57, %v165_v56  ;;  %v493_v62 = vld [vmem:[#allocation6 + $0x50] sm:$0xff]  ;;  %v496_v4 = vld [vmem:[#allocation6 + $0x68] sm:$0xff]  ;;  %v498_v7 = vld [vmem:[#allocation6 + $0x78] sm:$0xff] }
  0x38   :  { %v1070_v2 = vpack.c.bf16 %v494_v63, %v493_v62  ;;  %v1074_v5 = vpack.c.bf16 %v496_v4, %v495_v3  ;;  %v497_v6 = vld [vmem:[#allocation6 + $0x70] sm:$0xff]  ;;  %v756_v9 = vld [vmem:[%s1563_s4] ss:$0 sm:$0xff] }
  0x39   :  { %915 = vmatmul.mubr.msk.f32.gmra.mrb[6].mxu0 %vm269_vm3, %v250_v29  ;;  %1037 = vmatpush3.bf16.msra.mxu1 %v1036_v34  ;;  %v1078_v8 = vpack.c.bf16 %v498_v7, %v497_v6  ;;  %v1490_v13 = vld [vmem:[%s1567_s8] ss:$0 sm:$0xff] }
  0x3a   :  { %917 = vmatprep.mubr.msk.f32.mxu0 %vm269_vm3, %v251_v32  ;;  %1061 = vmatpush3.bf16.msra.mxu0 %v1058_v33 }
  0x3b   :  { %1038 = vmatprep.subr.bf16.mxu1 %v1254_v0  ;;  %1063 = vmatprep.subr.bf16.mxu0 %v1062_v55 }
  0x3d   :  { %918 = vmatmul.mubr.msk.f32.gmra.mrb[8].mxu0 %vm269_vm3, %v252_v35  ;;  %1040 = vmatpush3.bf16.msra.mxu1 %v1039_v39 }
  0x3e   :  { %920 = vmatprep.mubr.msk.f32.mxu0 %vm269_vm3, %v253_v38  ;;  %1041 = vmatprep.subr.bf16.mxu1 %v1254_v0 }
  0x3f   :  { %1065 = vmatpush3.bf16.msra.mxu0 %v1062_v55 }
  0x40   :  { %1067 = vmatprep.subr.bf16.mxu0 %v1066_v61 }
  0x41   :  { %921 = vmatmul.mubr.msk.f32.gmra.mrb[10].mxu0 %vm269_vm3, %v254_v40  ;;  %1043 = vmatpush3.bf16.msra.mxu1 %v1042_v44 }
  0x42   :  { %923 = vmatprep.mubr.msk.f32.mxu0 %vm269_vm3, %v255_v43  ;;  %1044 = vmatprep.subr.bf16.mxu1 %v1254_v0 }
  0x43   :  { %1069 = vmatpush3.bf16.msra.mxu0 %v1066_v61 }
  0x44   :  { %1071 = vmatprep.subr.bf16.mxu0 %v1070_v2 }
  0x45   :  { %924 = vmatmul.mubr.msk.f32.gmra.mrb[12].mxu0 %vm269_vm3, %v256_v45  ;;  %1046 = vmatpush3.bf16.msra.mxu1 %v1045_v49 }
  0x46   :  { %926 = vmatprep.mubr.msk.f32.mxu0 %vm269_vm3, %v257_v48  ;;  %1047 = vmatprep.subr.bf16.mxu1 %v1254_v0 }
  0x47   :  { %1073 = vmatpush3.bf16.msra.mxu0 %v1070_v2  ;;  %v1515_v2 = vld [vmem:[%s1569_s10] ss:$0 sm:$0xff] }
  0x48   :  { %1075 = vmatprep.subr.bf16.mxu0 %v1074_v5 }
  0x49   :  { %927 = vmatmul.mubr.msk.f32.gmra.mrb[14].mxu0 %vm269_vm3, %v258_v50  ;;  %1049 = vmatpush3.bf16.msra.mxu1 %v1048_v58 }
  0x4a   :  { %929 = vmatprep.mubr.msk.f32.mxu0 %vm269_vm3, %v259_v51  ;;  %1082 = vmatprep.subr.bf16.mxu1 %v1254_v0 }
  0x4b   :  { %1077 = vmatpush3.bf16.msra.mxu0 %v1074_v5 }
  0x4c   :  { %1079 = vmatprep.subr.bf16.mxu0 %v1078_v8 }
  0x4d   :  { %930 = vmatmul.mubr.msk.f32.gmra.mrb[16].mxu0 %vm269_vm3, %v260_v52 }
  0x4f   :  { %1081 = vmatpush3.bf16.msra.mxu0 %v1078_v8 }
 0x100   :  { %v146_v10 = vpop.f32.mrb[0].mxu0 }
 0x101   :  { %v147_v11 = vadd.f32 %v756_v9, %v146_v10  ;;  %v870_v12 = vpop.f32.mrb[1].mxu0 }
 0x103   :  { %v150_v14 = vmax.f32 %v147_v11, 0.0 }
 0x104   :  { %v910_v15 = vpop.f32.mrb[2].mxu0 }
 0x105   :  { %v394_v16 = vadd.f32 %v910_v15, %v1490_v13  ;;  %904 = vmatmul.mubr.f32.vlgmr.msra.gmra.mrb[0].mxu1 %v150_v14  ;;  %v388_v17 = vpop.f32.mrb[3].mxu0 }
 0x106   :  { %v389_v18 = vadd.f32 %v1490_v13, %v388_v17  ;;  %1020 = vmatprep.mubr.msk.f32.mxu1 %vm1255_vm0, %v1256_v1 }
 0x108   :  { %1114 = vtanh.f32 %v389_v18  ;;  %v913_v19 = vpop.f32.mrb[4].mxu0 }
 0x109   :  { %1116 = vtanh.f32 %v394_v16  ;;  %v404_v20 = vadd.f32 %v913_v19, %v1490_v13  ;;  %v398_v21 = vpop.f32.mrb[5].mxu0 }
 0x10a   :  { %v399_v22 = vadd.f32 %v1490_v13, %v398_v21 }
 0x10b   :  { %1118 = vtanh.f32 %v404_v20 }
 0x10c   :  { %1120 = vtanh.f32 %v399_v22  ;;  %v916_v23 = vpop.f32.mrb[6].mxu0 }
 0x10d   :  { %v414_v24 = vadd.f32 %v916_v23, %v1490_v13  ;;  %v408_v25 = vpop.f32.mrb[7].mxu0 }
 0x10e   :  { %v409_v26 = vadd.f32 %v1490_v13, %v408_v25 }
 0x10f   :  { %1122 = vtanh.f32 %v414_v24 }
 0x110   :  { %1124 = vtanh.f32 %v409_v26  ;;  %v919_v27 = vpop.f32.mrb[8].mxu0 }
 0x111   :  { %v424_v1 = vadd.f32 %v919_v27, %v1490_v13  ;;  %v418_v28 = vpop.f32.mrb[9].mxu0 }
 0x112   :  { %v1115_v29 = vpop.eup %1114  ;;  %v419_v30 = vadd.f32 %v1490_v13, %v418_v28 }
 0x113   :  { %v1117_v31 = vpop.eup %1116  ;;  %964 = vmatprep.mubr.f32.mxu0 %v1115_v29  ;;  %1126 = vtanh.f32 %v424_v1 }
 0x114   :  { %965 = vmatmul.mubr.f32.vlgmr.msra.gmra.mrb[18].mxu0 %v1117_v31  ;;  %1128 = vtanh.f32 %v419_v30  ;;  %v922_v32 = vpop.f32.mrb[10].mxu0 }
 0x115   :  { %v1119_v33 = vpop.eup %1118  ;;  %v434_v34 = vadd.f32 %v922_v32, %v1490_v13  ;;  %v428_v35 = vpop.f32.mrb[11].mxu0 }
 0x116   :  { %v1121_v36 = vpop.eup %1120  ;;  %v429_v37 = vadd.f32 %v1490_v13, %v428_v35 }
 0x117   :  { %967 = vmatprep.mubr.f32.mxu0 %v1121_v36  ;;  %1130 = vtanh.f32 %v434_v34 }
 0x118   :  { %968 = vmatmul.mubr.f32.gmra.mrb[20].mxu0 %v1119_v33  ;;  %1132 = vtanh.f32 %v429_v37  ;;  %v925_v38 = vpop.f32.mrb[12].mxu0 }
 0x119   :  { %v1123_v39 = vpop.eup %1122  ;;  %v444_v40 = vadd.f32 %v925_v38, %v1490_v13  ;;  %v438_v41 = vpop.f32.mrb[13].mxu0 }
 0x11a   :  { %v1125_v42 = vpop.eup %1124  ;;  %v439_v43 = vadd.f32 %v1490_v13, %v438_v41 }
 0x11b   :  { %970 = vmatprep.mubr.f32.mxu0 %v1125_v42  ;;  %1134 = vtanh.f32 %v444_v40 }
 0x11c   :  { %971 = vmatmul.mubr.f32.gmra.mrb[22].mxu0 %v1123_v39  ;;  %1136 = vtanh.f32 %v439_v43  ;;  %v928_v44 = vpop.f32.mrb[14].mxu0 }
 0x11d   :  { %v1127_v45 = vpop.eup %1126  ;;  %v454_v46 = vadd.f32 %v928_v44, %v1490_v13  ;;  %v448_v47 = vpop.f32.mrb[15].mxu0 }
 0x11e   :  { %v1129_v48 = vpop.eup %1128  ;;  %v449_v49 = vadd.f32 %v1490_v13, %v448_v47 }
 0x11f   :  { %973 = vmatprep.mubr.f32.mxu0 %v1129_v48  ;;  %1138 = vtanh.f32 %v454_v46 }
 0x120   :  { %974 = vmatmul.mubr.f32.gmra.mrb[24].mxu0 %v1127_v45  ;;  %1140 = vtanh.f32 %v449_v49  ;;  %v931_v50 = vpop.f32.mrb[16].mxu0 }
 0x121   :  { %v1131_v51 = vpop.eup %1130  ;;  %v464_v52 = vadd.f32 %v931_v50, %v1490_v13  ;;  %v458_v53 = vpop.f32.mrb[17].mxu0 }
 0x122   :  { %v1133_v54 = vpop.eup %1132  ;;  %v459_v55 = vadd.f32 %v1490_v13, %v458_v53 }
 0x123   :  { %976 = vmatprep.mubr.f32.mxu0 %v1133_v54  ;;  %1142 = vtanh.f32 %v464_v52 }
 0x124   :  { %977 = vmatmul.mubr.f32.gmra.mrb[26].mxu0 %v1131_v51  ;;  %1144 = vtanh.f32 %v459_v55 }
 0x125   :  { %v1135_v56 = vpop.eup %1134 }
 0x126   :  { %v1137_v57 = vpop.eup %1136 }
 0x127   :  { %979 = vmatprep.mubr.f32.mxu0 %v1137_v57 }
 0x128   :  { %980 = vmatmul.mubr.f32.gmra.mrb[28].mxu0 %v1135_v56 }
 0x129   :  { %v1139_v58 = vpop.eup %1138 }
 0x12a   :  { %v1141_v59 = vpop.eup %1140 }
 0x12b   :  { %982 = vmatprep.mubr.f32.mxu0 %v1141_v59 }
 0x12c   :  { %983 = vmatmul.mubr.f32.gmra.mrb[30].mxu0 %v1139_v58  ;;  %v758_v58 = vld [vmem:[%s1565_s6] ss:$0 sm:$0xff] }
 0x12d   :  { %v1143_v60 = vpop.eup %1142 }
 0x12e   :  { %v1145_v61 = vpop.eup %1144 }
 0x12f   :  { %985 = vmatprep.mubr.f32.mxu0 %v1145_v61  ;;  %v668_v61 = vstv %s1559_s0 }
 0x130   :  { %986 = vmatmul.mubr.f32.gmra.mrb[32].mxu0 %v1143_v60 }
 0x1d8   :  { %v1510_v62 = vpop.f32.mrb[0].mxu1 }
 0x1d9   :  { %v905_v63 = vpop.f32.mrb[1].mxu1  ;;  %v241_v59 = vadd.f32 %v758_v58, %v1510_v62 }
 0x1db   :  { %v244_v60 = vmax.f32 %v241_v59, 0.0 }
 0x1e7   :  { %v966_v3 = vpop.f32.mrb[18].mxu0 }
 0x1e8   :  { %v578_v4 = vadd.f32 %v966_v3, %v1515_v2  ;;  %v572_v5 = vpop.f32.mrb[19].mxu0 }
 0x1e9   :  { %v573_v6 = vadd.f32 %v1515_v2, %v572_v5 }
 0x1ea   :  { %1146 = vtanh.f32 %v578_v4 }
 0x1eb   :  { %1148 = vtanh.f32 %v573_v6  ;;  %v969_v7 = vpop.f32.mrb[20].mxu0 }
 0x1ec   :  { %v588_v8 = vadd.f32 %v969_v7, %v1515_v2  ;;  %v582_v9 = vpop.f32.mrb[21].mxu0 }
 0x1ed   :  { %v583_v10 = vadd.f32 %v1515_v2, %v582_v9 }
 0x1ee   :  { %1150 = vtanh.f32 %v588_v8 }
 0x1ef   :  { %1152 = vtanh.f32 %v583_v10  ;;  %v972_v11 = vpop.f32.mrb[22].mxu0 }
 0x1f0   :  { %v598_v12 = vadd.f32 %v972_v11, %v1515_v2  ;;  %v592_v13 = vpop.f32.mrb[23].mxu0 }
 0x1f1   :  { %v593_v14 = vadd.f32 %v1515_v2, %v592_v13 }
 0x1f2   :  { %1154 = vtanh.f32 %v598_v12 }
 0x1f3   :  { %1156 = vtanh.f32 %v593_v14  ;;  %v975_v15 = vpop.f32.mrb[24].mxu0 }
 0x1f4   :  { %v1147_v16 = vpop.eup %1146  ;;  %v608_v17 = vadd.f32 %v975_v15, %v1515_v2  ;;  %v602_v18 = vpop.f32.mrb[25].mxu0 }
 0x1f5   :  { %v1149_v19 = vpop.eup %1148  ;;  %v603_v20 = vadd.f32 %v1515_v2, %v602_v18 }
 0x1f6   :  { %v1083_v21 = vpack.c.bf16 %v1147_v16, %v1149_v19  ;;  %1158 = vtanh.f32 %v608_v17 }
 0x1f7   :  { %1160 = vtanh.f32 %v603_v20  ;;  %v978_v22 = vpop.f32.mrb[26].mxu0 }
 0x1f8   :  { %v1151_v23 = vpop.eup %1150  ;;  %1084 = vmatpush3.bf16.xpose.msra.mxu1 %v1083_v21  ;;  %v618_v24 = vadd.f32 %v978_v22, %v1515_v2  ;;  %v612_v25 = vpop.f32.mrb[27].mxu0 }
 0x1f9   :  { %v1153_v26 = vpop.eup %1152  ;;  %1085 = vmatprep.subr.bf16.mxu1 %v1254_v0  ;;  %v613_v27 = vadd.f32 %v1515_v2, %v612_v25 }
 0x1fa   :  { %v1086_v1 = vpack.c.bf16 %v1151_v23, %v1153_v26  ;;  %1162 = vtanh.f32 %v618_v24 }
 0x1fb   :  { %1164 = vtanh.f32 %v613_v27  ;;  %v981_v28 = vpop.f32.mrb[28].mxu0 }
 0x1fc   :  { %v1155_v29 = vpop.eup %1154  ;;  %v628_v30 = vadd.f32 %v981_v28, %v1515_v2  ;;  %v622_v31 = vpop.f32.mrb[29].mxu0 }
 0x1fd   :  { %v1157_v32 = vpop.eup %1156  ;;  %v623_v33 = vadd.f32 %v1515_v2, %v622_v31 }
 0x1fe   :  { %v1089_v34 = vpack.c.bf16 %v1155_v29, %v1157_v32  ;;  %1166 = vtanh.f32 %v628_v30 }
 0x1ff   :  { %1168 = vtanh.f32 %v623_v33  ;;  %v984_v35 = vpop.f32.mrb[30].mxu0 }
 0x200   :  { %v1159_v36 = vpop.eup %1158  ;;  %1087 = vmatpush3.bf16.xpose.msra.mxu1 %v1086_v1  ;;  %v638_v37 = vadd.f32 %v984_v35, %v1515_v2  ;;  %v632_v38 = vpop.f32.mrb[31].mxu0 }
 0x201   :  { %v1161_v39 = vpop.eup %1160  ;;  %1088 = vmatprep.subr.bf16.mxu1 %v1254_v0  ;;  %v633_v40 = vadd.f32 %v1515_v2, %v632_v38 }
 0x202   :  { %v1092_v41 = vpack.c.bf16 %v1159_v36, %v1161_v39  ;;  %1170 = vtanh.f32 %v638_v37 }
 0x203   :  { %1172 = vtanh.f32 %v633_v40  ;;  %v987_v42 = vpop.f32.mrb[32].mxu0 }
 0x204   :  { %v1163_v43 = vpop.eup %1162  ;;  %v648_v44 = vadd.f32 %v987_v42, %v1515_v2  ;;  %v642_v45 = vpop.f32.mrb[33].mxu0 }
 0x205   :  { %v1165_v46 = vpop.eup %1164  ;;  %v643_v47 = vadd.f32 %v1515_v2, %v642_v45 }
 0x206   :  { %v1095_v48 = vpack.c.bf16 %v1163_v43, %v1165_v46  ;;  %1174 = vtanh.f32 %v648_v44 }
 0x207   :  { %1176 = vtanh.f32 %v643_v47 }
 0x208   :  { %v1167_v49 = vpop.eup %1166  ;;  %1090 = vmatpush3.bf16.xpose.msra.mxu1 %v1089_v34 }
 0x209   :  { %v1169_v50 = vpop.eup %1168  ;;  %1091 = vmatprep.subr.bf16.mxu1 %v1254_v0 }
 0x20a   :  { %v1098_v51 = vpack.c.bf16 %v1167_v49, %v1169_v50 }
 0x20c   :  { %v1171_v52 = vpop.eup %1170 }
 0x20d   :  { %v1173_v53 = vpop.eup %1172 }
 0x20e   :  { %v1101_v54 = vpack.c.bf16 %v1171_v52, %v1173_v53 }
 0x210   :  { %v1175_v55 = vpop.eup %1174  ;;  %1093 = vmatpush3.bf16.xpose.msra.mxu1 %v1092_v41 }
 0x211   :  { %v1177_v56 = vpop.eup %1176  ;;  %1094 = vmatprep.subr.bf16.mxu1 %v1254_v0 }
 0x212   :  { %v1104_v57 = vpack.c.bf16 %v1175_v55, %v1177_v56 }
 0x218   :  { %1096 = vmatpush3.bf16.xpose.msra.mxu1 %v1095_v48 }
 0x219   :  { %1097 = vmatprep.subr.bf16.mxu1 %v1254_v0 }
 0x220   :  { %1099 = vmatpush3.bf16.xpose.msra.mxu1 %v1098_v51 }
 0x221   :  { %1100 = vmatprep.subr.bf16.mxu1 %v1254_v0 }
 0x228   :  { %1102 = vmatpush3.bf16.xpose.msra.mxu1 %v1101_v54 }
 0x229   :  { %1103 = vmatprep.subr.bf16.mxu1 %v1254_v0 }
 0x230   :  { %1105 = vmatpush3.bf16.xpose.msra.mxu1 %v1104_v57 }
 0x237   :  { %1021 = vmatmul.mubr.f32.vlgmr.msra.gmra.mrb[2].mxu1 %v244_v60 }
 0x30a   :  { %v735_v63 = vpop.f32.mrb[2].mxu1 }
 0x30b   :  { %v736_v2 = vadd.f32 %v735_v63, %v668_v61  ;;  %v1022_v3 = vpop.f32.mrb[3].mxu1 }
 0x30d   :  { %739 = vst [vmem:[#allocation8] sm:$0xff] %v736_v2 }
 0x30e   :  { %1233 = shalt.err (!%p1230_p6)
}
 0x30f   :  { %s1234_s3 = scalar_lea.hbm %s1570_s11, 128 }
 0x310   :  { %p1235_p7 = scmp.ne.s32.totalorder %s1570_s11, %s1234_s3  ;;  %p1238_p8 = scmp.lt.u32.totalorder %s1234_s3, %s1570_s11 }
 0x312   :  { %p1240_p9 = pnand %p1238_p8, %p1235_p7 }
 0x314   :  { %1243 = shalt.err (!%p1240_p9)
}
 0x315   :  { %749 = dma.vmem_to_hbm [thread:$0]  %s747_s29, 128, %s1570_s11, [#allocation5]  }
 0x316   :  { %1248 = dma.done.wait [#allocation5], 128  }
 0x317   :  { %1249 = vsyncadd [#allocation5], 4294967168 }
 0x318   :  { %753 = vsyncpa [#allocation4], 1 }
 0x319   :  { %754 = vsyncpa [#allocation7], 1 }
 0x31a   :  { %755 = vsyncpa [#allocation5], 1 }

</bundles_post_ra>
